<compile_context>
chip_gen: v5e
topology: v5e:2x2
jax: 0.10.0
libtpu: 0.0.40
codegen_flags: <defaults>
</compile_context>

<pallas_src>
import jax
import jax.numpy as jnp
from jax.experimental import pallas as pl
from jax.experimental.pallas import tpu as pltpu


def _make_kernel(*, layout, tanh_dtype, flatten_store):
    def kernel(x_ref, w12_ref, b12_ref, v_ref, vb_ref, o_ref):
        # x_ref:   (TB, N, D)   VMEM
        # w12_ref: (D, 2A)      VMEM   (W1 | W2 concatenated along output features)
        # b12_ref: (1, 2A)      VMEM
        # v_ref:   (1, A) or (A, 1) VMEM (orientation matches `layout`)
        # vb_ref:  (1, 1)       SMEM   (out-projection bias, scalar)
        # o_ref:   (TB, 1, N*N) or (TB, N, N) VMEM
        TB, N, D = x_ref.shape
        A = w12_ref.shape[1] // 2

        # Fused mlp1 + mlp2: one MXU pass over the concatenated (D, 2A) weights.
        if N % 8 == 0:
            # (TB, N, D) -> (TB*N, D) merge is layout-free when N is a sublane multiple.
            x2d = x_ref[...].reshape(TB * N, D)
            x12 = (jnp.dot(x2d, w12_ref[...], preferred_element_type=jnp.float32)
                   + b12_ref[...]).reshape(TB, N, 2 * A)
        else:
            # Non-aligned N: per-batch 2D matmuls (avoids the VMEM relayout copy a
            # tile-crossing reshape would materialize).
            x12 = jnp.stack(
                [jnp.dot(x_ref[b], w12_ref[...], preferred_element_type=jnp.float32)
                 for b in range(TB)], axis=0) + b12_ref[...]

        x1 = x12[:, :, :A]   # mlp1 -> key side   (broadcast over query index i)
        x2 = x12[:, :, A:]   # mlp2 -> query side (broadcast over key index j)

        if layout == "keys_on_lanes":
            # Keys (j) on the lane axis, A on sublanes: one small XLU transpose per batch,
            # lane-dense tanh/mul/reduce for large N; v_ref is an (A, 1) column.
            x1_t = jnp.swapaxes(x1, -1, -2)                                        # (TB, A, N)
            t = jnp.tanh((x2[:, :, :, None] + x1_t[:, None, :, :]).astype(tanh_dtype))  # (TB,N,A,N)
            s = jnp.sum(t * v_ref[...], axis=-2) + vb_ref[0, 0]                    # (TB, N, N) f32
        else:
            # A on lanes (fine when N is small); v_ref is a (1, A) row.
            t = jnp.tanh((x2[:, :, None, :] + x1[:, None, :, :]).astype(tanh_dtype))    # (TB,N,N,A)
            s = jnp.sum(t * v_ref[...], axis=-1) + vb_ref[0, 0]                    # (TB, N, N) f32

        if flatten_store:
            # Lane-dense flattened store (N < 128): one unmasked vst row per batch.
            o_ref[...] = s.reshape(TB, 1, N * N).astype(o_ref.dtype)
        else:
            o_ref[...] = s.astype(o_ref.dtype)

    return kernel


def additive_attention(x, w1, b1, w2, b2, v, vb, *, include_root=False, batch_tile=None,
                       layout="auto", tanh_dtype=jnp.float32):
    """x: (B, N, D); w1/w2: (D, A) (pre-transposed vs. PyTorch); b1/b2: (A,); v: (A,); vb: ()."""
    B, N, D = x.shape
    A = w1.shape[1]

    if batch_tile is None:
        # Prefer a >= 2-step grid along the "parallel" batch axis so both v7x TensorCores get
        # work; extra per-step overhead (~0.35us) is negligible on single-TC v5e/v6e.
        batch_tile = B // 2 if (B >= 2 and B % 2 == 0) else B
    assert B % batch_tile == 0, "batch_tile must divide batch size"

    if layout == "auto":
        # keys-on-lanes only pays once N approaches the 128-lane vreg width.
        layout = "keys_on_lanes" if N >= 128 else "attn_on_lanes"
    assert layout in ("keys_on_lanes", "attn_on_lanes")

    flatten_store = N < 128   # write a lane-dense (TB, 1, N*N) slab when N is narrow

    # Fuse the two linear layers in the wrapper: one MXU pass in the kernel.
    w12 = jnp.concatenate([w1, w2], axis=1).astype(jnp.float32)                              # (D, 2A)
    b12 = jnp.concatenate([b1.reshape(-1), b2.reshape(-1)])[None, :].astype(jnp.float32)     # (1, 2A)
    vb_s = jnp.asarray(vb, jnp.float32).reshape(1, 1)                                        # SMEM scalar

    if layout == "keys_on_lanes":
        v_in = v.reshape(A, 1).astype(jnp.float32)          # column: broadcasts over key lanes
        v_spec = pl.BlockSpec((A, 1), lambda b: (0, 0))
    else:
        v_in = v.reshape(1, A).astype(jnp.float32)          # row: broadcasts over A lanes
        v_spec = pl.BlockSpec((1, A), lambda b: (0, 0))

    if flatten_store:
        out_shape = jax.ShapeDtypeStruct((B, 1, N * N), jnp.float32)
        out_spec = pl.BlockSpec((batch_tile, 1, N * N), lambda b: (b, 0, 0))
    else:
        out_shape = jax.ShapeDtypeStruct((B, N, N), jnp.float32)
        out_spec = pl.BlockSpec((batch_tile, N, N), lambda b: (b, 0, 0))

    # Tell XLA this call is EUP-heavy, not byte-trivial.
    cost = pl.CostEstimate(
        flops=2 * B * N * D * (2 * A) + 2 * B * N * N * A,
        transcendentals=B * N * N * A,
        bytes_accessed=4 * (B * N * D + D * 2 * A + 2 * A + A + 1 + B * N * N),
    )

    kernel = _make_kernel(layout=layout, tanh_dtype=tanh_dtype, flatten_store=flatten_store)

    out = pl.pallas_call(
        kernel,
        out_shape=out_shape,
        grid_spec=pltpu.PrefetchScalarGridSpec(
            num_scalar_prefetch=0,
            grid=(B // batch_tile,),
            in_specs=[
                pl.BlockSpec((batch_tile, N, D), lambda b: (b, 0, 0)),
                pl.BlockSpec((D, 2 * A), lambda b: (0, 0)),
                pl.BlockSpec((1, 2 * A), lambda b: (0, 0)),
                v_spec,
                pl.BlockSpec(memory_space=pltpu.MemorySpace.SMEM),
            ],
            out_specs=out_spec,
        ),
        compiler_params=pltpu.CompilerParams(
            dimension_semantics=("parallel",),
            # Above the 32 MiB scoped default on v5e/v6e, within v7x's 64 MiB physical VMEM.
            vmem_limit_bytes=64 * 1024 * 1024,
        ),
        cost_estimate=cost,
    )(x.astype(jnp.float32), w12, b12, v_in, vb_s)

    out_full = out.reshape(B, N, N)
    if include_root:
        return out_full
    # TODO(synk): for large N, skip the ROOT query row via a query-tile index_map instead of
    # paying this extra HBM read+write in XLA.
    return out_full[:, 1:, :]


def reference(x, w1, b1, w2, b2, v, vb):
    x1 = x @ w1 + b1                                        # (B, N, A)
    x2 = x @ w2 + b2                                        # (B, N, A)
    t = jnp.tanh(x2[:, :, None, :] + x1[:, None, :, :])     # (B, N, N, A)
    t = t[:, 1:, :, :]
    return jnp.einsum("bija,a->bij", t, v) + vb


if __name__ == "__main__":
    # Small shapes implied by the module: (batch, seq, input_dim), attention_dim.
    B, N, D, A = 2, 8, 32, 32

    key = jax.random.PRNGKey(0)
    kx, k1, kb1, k2, kb2, kv, kvb = jax.random.split(key, 7)

    x = jax.random.normal(kx, (B, N, D), dtype=jnp.float32)

    # Deterministic synthetic parameters (PyTorch Linear init ranges; weights stored transposed).
    bound1 = 1.0 / jnp.sqrt(D)
    w1 = jax.random.uniform(k1, (D, A), minval=-bound1, maxval=bound1, dtype=jnp.float32)
    b1 = jax.random.uniform(kb1, (A,), minval=-bound1, maxval=bound1, dtype=jnp.float32)
    w2 = jax.random.uniform(k2, (D, A), minval=-bound1, maxval=bound1, dtype=jnp.float32)
    b2 = jax.random.uniform(kb2, (A,), minval=-bound1, maxval=bound1, dtype=jnp.float32)
    bound2 = 1.0 / jnp.sqrt(A)
    v = jax.random.uniform(kv, (A,), minval=-bound2, maxval=bound2, dtype=jnp.float32)
    vb = jax.random.uniform(kvb, (), minval=-bound2, maxval=bound2, dtype=jnp.float32)

    ref = reference(x, w1, b1, w2, b2, v, vb)

    # Default path: A-on-lanes tanh layout, lane-dense flattened store, 2-step parallel grid.
    out = jax.block_until_ready(additive_attention(x, w1, b1, w2, b2, v, vb))
    assert out.shape == (B, N - 1, N), out.shape
    assert jnp.allclose(out, ref, atol=1e-5, rtol=1e-5), "mismatch vs reference (default path)"

    # Large-N layout (keys on lanes, A on sublanes) exercised at small N for correctness.
    out_kl = jax.block_until_ready(
        additive_attention(x, w1, b1, w2, b2, v, vb, layout="keys_on_lanes"))
    assert out_kl.shape == (B, N - 1, N), out_kl.shape
    assert jnp.allclose(out_kl, ref, atol=1e-5, rtol=1e-5), "mismatch vs reference (keys_on_lanes)"

    print("KERNEL_OK")
</pallas_src>

<mosaic_0001>
module attributes {stable_mosaic.version = 11 : i64} {
  func.func @kernel(%arg0: i32, %arg1: memref<1x8x32xf32, #tpu.memory_space<vmem>>, %arg2: memref<32x64xf32, #tpu.memory_space<vmem>>, %arg3: memref<1x64xf32, #tpu.memory_space<vmem>>, %arg4: memref<1x32xf32, #tpu.memory_space<vmem>>, %arg5: memref<1x1xf32, #tpu.memory_space<smem>>, %arg6: memref<1x1x64xf32, #tpu.memory_space<vmem>>) attributes {dimension_semantics = [#tpu.dimension_semantics<parallel>], iteration_bounds = array<i64: 2>, scalar_prefetch = 0 : i64, scratch_operands = 0 : i64, tpu.core_type = #tpu.core_type<tc>, window_params = [{transform_indices = @transform_0, window_bounds = array<i64: 1, 8, 32>}, {pipeline_mode = #tpu.pipeline_mode<synchronous>, transform_indices = @transform_1, window_bounds = array<i64: 32, 64>}, {pipeline_mode = #tpu.pipeline_mode<synchronous>, transform_indices = @transform_2, window_bounds = array<i64: 1, 64>}, {pipeline_mode = #tpu.pipeline_mode<synchronous>, transform_indices = @transform_3, window_bounds = array<i64: 1, 32>}, {transform_indices = @transform_4, window_bounds = array<i64: 1, 1>}, {transform_indices = @transform_5, window_bounds = array<i64: 1, 1, 64>}]} {
    %c0 = arith.constant 0 : index
    %c0_0 = arith.constant 0 : index
    %c0_1 = arith.constant 0 : index
    %0 = vector.load %arg1[%c0, %c0_0, %c0_1] : memref<1x8x32xf32, #tpu.memory_space<vmem>>, vector<1x8x32xf32>
    %1 = vector.shape_cast %0 : vector<1x8x32xf32> to vector<8x32xf32>
    %c0_2 = arith.constant 0 : index
    %c0_3 = arith.constant 0 : index
    %2 = vector.load %arg2[%c0_2, %c0_3] : memref<32x64xf32, #tpu.memory_space<vmem>>, vector<32x64xf32>
    %cst = arith.constant dense<0.000000e+00> : vector<8x64xf32>
    %3 = tpu.matmul %1, %2, %cst {dimension_numbers = #tpu.dot_dimension_numbers<[1], [0], [0], [1], [0, 0, 1, 1], [], []>} : vector<8x32xf32>, vector<32x64xf32>, vector<8x64xf32> -> vector<8x64xf32>
    %c0_4 = arith.constant 0 : index
    %c0_5 = arith.constant 0 : index
    %4 = vector.load %arg3[%c0_4, %c0_5] : memref<1x64xf32, #tpu.memory_space<vmem>>, vector<1x64xf32>
    %5 = vector.broadcast %4 : vector<1x64xf32> to vector<8x64xf32>
    %6 = arith.addf %3, %5 : vector<8x64xf32>
    %7 = vector.shape_cast %6 : vector<8x64xf32> to vector<1x8x64xf32>
    %8 = vector.extract_strided_slice %7 {offsets = [0, 0, 0], sizes = [1, 8, 32], strides = [1, 1, 1]} : vector<1x8x64xf32> to vector<1x8x32xf32>
    %9 = vector.extract_strided_slice %7 {offsets = [0, 0, 32], sizes = [1, 8, 32], strides = [1, 1, 1]} : vector<1x8x64xf32> to vector<1x8x32xf32>
    %10 = vector.shape_cast %9 : vector<1x8x32xf32> to vector<1x8x1x32xf32>
    %11 = vector.shape_cast %8 : vector<1x8x32xf32> to vector<1x1x8x32xf32>
    %12 = vector.broadcast %10 : vector<1x8x1x32xf32> to vector<1x8x8x32xf32>
    %13 = vector.broadcast %11 : vector<1x1x8x32xf32> to vector<1x8x8x32xf32>
    %14 = arith.addf %12, %13 : vector<1x8x8x32xf32>
    %15 = math.tanh %14 : vector<1x8x8x32xf32>
    %c0_6 = arith.constant 0 : index
    %c0_7 = arith.constant 0 : index
    %16 = vector.load %arg4[%c0_6, %c0_7] : memref<1x32xf32, #tpu.memory_space<vmem>>, vector<1x32xf32>
    %17 = vector.shape_cast %16 : vector<1x32xf32> to vector<1x1x1x32xf32>
    %18 = vector.broadcast %17 : vector<1x1x1x32xf32> to vector<1x8x8x32xf32>
    %19 = arith.mulf %15, %18 : vector<1x8x8x32xf32>
    %cst_8 = arith.constant dense<0.000000e+00> : vector<1x8x8xf32>
    %20 = vector.multi_reduction <add>, %19, %cst_8 [3] : vector<1x8x8x32xf32> to vector<1x8x8xf32>
    %c0_9 = arith.constant 0 : index
    %c0_10 = arith.constant 0 : index
    %21 = memref.load %arg5[%c0_9, %c0_10] : memref<1x1xf32, #tpu.memory_space<smem>>
    %22 = vector.broadcast %21 : f32 to vector<1x8x8xf32>
    %23 = arith.addf %20, %22 : vector<1x8x8xf32>
    %24 = vector.shape_cast %23 : vector<1x8x8xf32> to vector<1x1x64xf32>
    %c0_11 = arith.constant 0 : index
    %c0_12 = arith.constant 0 : index
    %c0_13 = arith.constant 0 : index
    %25 = vector.load %arg6[%c0_11, %c0_12, %c0_13] : memref<1x1x64xf32, #tpu.memory_space<vmem>>, vector<1x1x64xf32>
    tpu.vector_store %arg6[%c0_11, %c0_12, %c0_13], %24 {strides = array<i32>} : memref<1x1x64xf32, #tpu.memory_space<vmem>>, vector<1x1x64xf32>,
    return
  }
  func.func @transform_0(%arg0: i32) -> (i32, i32, i32) {
    %c0_i32 = arith.constant 0 : i32
    %c0_i32_0 = arith.constant 0 : i32
    %c0_i32_1 = arith.constant 0 : i32
    return %arg0, %c0_i32, %c0_i32_0 : i32, i32, i32
  }
  func.func @transform_1(%arg0: i32) -> (i32, i32) {
    %c0_i32 = arith.constant 0 : i32
    %c0_i32_0 = arith.constant 0 : i32
    %c0_i32_1 = arith.constant 0 : i32
    return %c0_i32, %c0_i32_0 : i32, i32
  }
  func.func @transform_2(%arg0: i32) -> (i32, i32) {
    %c0_i32 = arith.constant 0 : i32
    %c0_i32_0 = arith.constant 0 : i32
    %c0_i32_1 = arith.constant 0 : i32
    return %c0_i32, %c0_i32_0 : i32, i32
  }
  func.func @transform_3(%arg0: i32) -> (i32, i32) {
    %c0_i32 = arith.constant 0 : i32
    %c0_i32_0 = arith.constant 0 : i32
    %c0_i32_1 = arith.constant 0 : i32
    return %c0_i32, %c0_i32_0 : i32, i32
  }
  func.func @transform_4(%arg0: i32) -> (i32, i32) {
    %c0_i32 = arith.constant 0 : i32
    %c0_i32_0 = arith.constant 0 : i32
    %c0_i32_1 = arith.constant 0 : i32
    return %c0_i32, %c0_i32_0 : i32, i32
  }
  func.func @transform_5(%arg0: i32) -> (i32, i32, i32) {
    %c0_i32 = arith.constant 0 : i32
    %c0_i32_0 = arith.constant 0 : i32
    %c0_i32_1 = arith.constant 0 : i32
    return %arg0, %c0_i32, %c0_i32_0 : i32, i32, i32
  }
}

</mosaic_0001>

<bundles_post_ra>
// kernel: tpu_custom_call.1
= control target key start
LH: loop header
LB: loop body
LE: loop exit
PB: predicated region body
PF: predicated region fallthrough
CT: control target
= control target key end

     0   :  { %s1059_s0 = inlined_call_operand.hbm [shape: f32[2,8,32], index: 0, kind: input, shape index: {}]   ;;  %s1060_s1 = inlined_call_operand.hbm [shape: f32[32,64], index: 1, kind: input, shape index: {}]   ;;  %s1061_s2 = inlined_call_operand.vmem [shape: f32[1,64], index: 2, kind: input, shape index: {}]   ;;  %s1062_s3 = inlined_call_operand.vmem [shape: f32[1,32], index: 3, kind: input, shape index: {}]   ;;  %s1063_s4 = inlined_call_operand.<no memory space> [shape: f32[1,1], index: 4, kind: input, shape index: {}]   ;;  %s1064_s5 = inlined_call_operand.hbm [shape: f32[2,1,64], index: 5, kind: output, shape index: {}]  }
   0x1   :  { %10 = sst [smem:[#allocation2]] %s1063_s4 }
   0x2   :  { %11 = vsyncpa [#allocation4], 0 }
   0x3   :  { %13 = vsyncpa [#allocation4 + $0x1], 0 }
   0x4   :  { %14 = vsyncpa [#allocation7], 0 }
   0x5   :  { %15 = vsyncpa [#allocation5], 0 }
   0x6   :  { %17 = vsyncpa [#allocation5 + $0x1], 0  ;;  %s896_s20 = smov 0   ;;  %s898_s21 = smov 0  }
   0x7   :  { %s900_s22 = smov 0   ;;  %s902_s23 = smov 0  }
   0x8 LB: > { %s175_s25 = sshll.u32 %s1060_s1, 4  ;;  %s920_s26 = sadd.s32 4294967295, %s848_s23   ;;  %s848_s23 = sphi %s902_s23, %s1074_s23   ;;  %s844_s22 = sphi %s900_s22, %s1073_s22   ;;  %s840_s21 = sphi %s898_s21, %s1072_s21   ;;  %s836_s20 = sphi %s896_s20, %s1071_s20   ;;  %s176_s25 = int_to_ptr.hbm [resolvable:$true] %s175_s25 }
   0x9   : > { %p620_p0 = scmp.ge.s32.totalorder %s848_s23, 1  ;;  %p44_p1 = scmp.eq.s32.totalorder %s920_s26, 0 }
   0xa   : > { %p164_p2 = scmp.lt.s32.totalorder %s848_s23, 3  ;;  %s850_s28 = smov [#allocation6]  }
   0xb   : > { %s177_s29 = sshll.u32 %s850_s28, 4  ;;  %s851_s30 = smov 128   ;;  %s178_s29 = int_to_ptr.vmem [resolvable:$true] %s177_s29 }
   0xc   : > { %p925_p3 = pnand %p620_p0, %p164_p2  ;;  %s852_s6 = smov 8  }
   0xd   : > { %s619_s7 = sadd.s32 4294967294, %s848_s23   ;;  %s936_s8 = sadd.s32 1, %s848_s23  }
   0xe   : > { %p639_p4 = pneg %p925_p3  ;;  %s30_s9 = sadd.s32 1, %s844_s22 }
   0xf   : > { %s27_s10 = ssub.s32 %s848_s23, %s936_s8  ;;  %p37_p7 = scmp.ne.s32.totalorder %s844_s22, %s840_s21 }
  0x10   : > { %p640_p6 = pnand %p639_p4, %p44_p1  ;;  %p28_p8 = scmp.eq.s32.totalorder %s27_s10, 0 }
  0x11   : > { %p38_p9 = scmp.eq.s32.totalorder %s848_s23, 0  ;;  %p43_p10 = scmp.ne.s32.totalorder %s840_s21, %s836_s20 }
  0x12   : > { %642 = dma.hbm_to_vmem [thread:$0]  (!%p640_p6), %s176_s25, 512, %s178_s29, [#allocation7], %s851_s30, %s851_s30, %s852_s6  }
  0x13   : > { %p151_p11 = scmp.eq.s32.totalorder %s920_s26, 1  ;;  %p952_p12 = por %p44_p1, %p43_p10 }
  0x14   : > { %s948_s11 = scalar_select %p28_p8, %s844_s22, %s30_s9  }
  0x15   : > { %p956_p13 = por %p151_p11, %p37_p7  ;;  %p157_p0 = scmp.eq.s32.totalorder %s619_s7, 1 }
  0x16   : > { %p39_p2 = por %p38_p9, %p37_p7  ;;  %s200_s14 = sand.u32 1, %s844_s22  }
  0x17   : > { %p961_p4 = por %p157_p0, %p43_p10  ;;  %p652_p6 = scmp.lt.s32.totalorder %s848_s23, 2 }
  0x18   : > { %s623_s16 = sshll.u32 %s200_s14, 3  ;;  %s624_s17 = sshll.u32 %s848_s23, 3 }
  0x19   : > { %s208_s4 = scalar_lea.hbm %s1059_s0, %s624_s17  ;;  %s204_s25 = scalar_lea.vmem [#allocation3], %s623_s16 }
  0x1a   : > { %s210_s24 = sshll.u32 %s208_s4, 4  ;;  %s212_s28 = sshll.u32 %s204_s25, 4  ;;  %s211_s24 = int_to_ptr.hbm [resolvable:$true] %s210_s24  ;;  %s213_s28 = int_to_ptr.vmem [resolvable:$true] %s212_s28 }
  0x1b   : > { %p970_p8 = pnand %p652_p6, %p39_p2  ;;  %s201_s30 = scalar_lea.sflag [#allocation4], %s200_s14 }
  0x1c   : > { %s748_s6 = sshra.s32 %s211_s24, 4  ;;  %s755_s16 = scalar_lea.hbm %s1059_s0, 16  ;;  %s749_s6 = int_to_ptr.hbm [resolvable:$true] %s748_s6 }
  0x1d   : > { %s750_s7 = scalar_lea.hbm %s749_s6, 8  ;;  %p752_p9 = pneg %p970_p8 }
  0x1e   : > { %p751_p7 = scmp.ne.s32.totalorder %s749_s6, %s750_s7  ;;  %p756_p0 = scmp.lt.s32.totalorder %s749_s6, %s1059_s0 }
  0x1f   : > { %p757_p2 = scmp.lt.s32.totalorder %s755_s16, %s750_s7 }
  0x20   : > { %p753_p10 = pnand %p752_p9, %p751_p7 }
  0x21   : > { %p758_p6 = por %p757_p2, %p756_p0 }
  0x22   : > { %p754_p11 = pneg %p753_p10 }
  0x24   : > { %p759_p5 = pnand %p758_p6, %p754_p11 }
  0x26   : > { %762 = shalt.err (!%p759_p5)
}
  0x27   : > { %646 = dma.hbm_to_vmem [thread:$0]  (!%p970_p8), %s211_s24, 128, %s213_s28, %s201_s30  }
  0x28   : > { %221 = sbr.rel (%p925_p3) target bundleno = 715 (0x2cb), region = 40  ;;  %s987_s14 = sand.u32 (!%p925_p3), 1, %s840_s21  }
  0x29   : > { %s626_s19 = sshll.u32 (!%p925_p3), %s987_s14, 3  ;;  %s224_s4 = scalar_lea.sflag (!%p925_p3), [#allocation4], %s987_s14 }
  0x2a   : > { %s227_s25 = scalar_lea.vmem (!%p925_p3), [#allocation3], %s626_s19 }
  0x2d   : > { %823 = dma.done.wait (%p952_p12), %s224_s4, 128  }
  0x2e   : > { %825 = vsyncadd (%p952_p12), %s224_s4, 4294967168 }
  0x2f   : > { %827 = dma.done.wait (%p44_p1), [#allocation7], 512  }
  0x30   : > { %829 = vsyncadd (%p44_p1), [#allocation7], 4294966784  ;;  %v263_v0 = vld [vmem:[#allocation6 + $0x18] sm:$0xff]  ;;  %v262_v1 = vld [vmem:[#allocation6 + $0x10] sm:$0xff]  ;;  %vm268_vm0 = vcmask 261120   ;;  %s853_s24 = smov 32  }
  0x31   : > { %284 = vmatpush.msra.mxu0 %v263_v0  ;;  %v261_v2 = vld [vmem:[#allocation6 + $0x8] sm:$0xff]  ;;  %v260_v3 = vld [vmem:[#allocation6] sm:$0xff]  ;;  %v259_v4 = vld [vmem:[%s227_s25] sm:$0xff]  ;;  %s854_s30 = smov 96   ;;  %s405_s6 = sld [smem:[#allocation2]]  ;;  %vm433_vm1 = vcmask 1041409  }
  0x32   : > { %v700_v5 = vld [vmem:[%s1061_s2] ss:$0 sm:$0xff]  ;;  %vm435_vm2 = vcmask 1042434   ;;  %vm437_vm3 = vcmask 1043459   ;;  %vm439_vm4 = vcmask 1044484   ;;  %vm441_vm5 = vcmask 1045509   ;;  %s539_s25 = scalar_lea.hbm %s1064_s5, %s920_s26 }
  0x33   : > { %285 = vmatpush.msra.mxu0 %v262_v1  ;;  %v701_v8 = vld [vmem:[%s1062_s3] ss:$0 sm:$0xff]  ;;  %vm443_vm6 = vcmask 1046534   ;;  %vm445_vm7 = vcmask 1047559   ;;  %vm449_vm8 = vcmask 1047556   ;;  %s857_s7 = smov 8  }
  0x34   : > { %s858_s9 = smov 16   ;;  %s859_s10 = smov 24   ;;  %vm515_vm9 = vcmask 64512   ;;  %vm517_vm10 = vcmask 130048   ;;  %vm519_vm11 = vcmask 195584   ;;  %vm522_vm12 = vcmask 326656  }
  0x35   : > { %286 = vmatpush.msra.mxu0 %v261_v2  ;;  %s860_s16 = smov 40   ;;  %s861_s17 = smov 48   ;;  %vm524_vm13 = vcmask 392192   ;;  %vm526_vm14 = vcmask 457728   ;;  %vm528_vm15 = vcmask 516096  }
  0x36   : > { %s862_s18 = smov 56   ;;  %s258_s27 = scalar_lea.vmem [#allocation8], %s987_s14 }
  0x37   : > { %287 = vmatpush.msra.mxu0 %v260_v3  ;;  %s541_s12 = sshll.u32 %s258_s27, 4  ;;  %s531_s28 = scalar_lea.sflag [#allocation5], %s987_s14  ;;  %s542_s12 = int_to_ptr.vmem [resolvable:$true] %s541_s12 }
  0x38   : > { %628 = vmatmul.msk.f32.vlgmr.msra.gmra.mxu0 %vm268_vm0, %v259_v4  ;;  %v423_v4 = vlaneseq }
  0xb5   : > { %v289_v6 = vpop.f32.mrf.mxu0 }
  0xb6   : > { %v290_v7 = vadd.f32 %v700_v5, %v289_v6  ;;  %v406_v5 = vstv %s405_s6 }
  0xb8   : > { %316 = vrot.lane.b32.xlu0 %v290_v7, %s853_s24  ;;  %v296_v9 = vrot.slane %v290_v7, 4  ;;  %v294_v10 = vrot.slane %v290_v7, 2  ;;  %v300_v11 = vperm.slane %v290_v7, 0  ;;  %v293_v14 = vrot.slane %v290_v7, 1 }
  0xb9   : > { %v299_v16 = vrot.slane %v290_v7, 7  ;;  %v295_v20 = vrot.slane %v290_v7, 3  ;;  %v297_v27 = vrot.slane %v290_v7, 5  ;;  %v298_v30 = vrot.slane %v290_v7, 6 }
  0xba   : > { %v304_v12 = vperm.slane %v296_v9, 0  ;;  %v302_v13 = vperm.slane %v294_v10, 0  ;;  %v301_v21 = vperm.slane %v293_v14, 0  ;;  %v424_v9 = vand.u32 127, %v423_v4 }
  0xbb   : > { %v307_v22 = vperm.slane %v299_v16, 0  ;;  %v303_v23 = vperm.slane %v295_v20, 0  ;;  %v305_v35 = vperm.slane %v297_v27, 0  ;;  %v306_v37 = vperm.slane %v298_v30, 0 }
  0xc0   : > { %338 = vrot.lane.b32.xlu0 %v701_v8, %s853_s24 }
 0x12a   : > { %v317_v15 = vpop.permute.xlu0 %316 }
 0x12b   : > { %v319_v17 = vadd.f32 %v317_v15, %v300_v11  ;;  %v323_v18 = vadd.f32 %v317_v15, %v304_v12  ;;  %v321_v19 = vadd.f32 %v317_v15, %v302_v13  ;;  %v320_v24 = vadd.f32 %v317_v15, %v301_v21 }
 0x12c   : > { %v326_v25 = vadd.f32 %v317_v15, %v307_v22  ;;  %v322_v26 = vadd.f32 %v317_v15, %v303_v23  ;;  %v324_v38 = vadd.f32 %v317_v15, %v305_v35  ;;  %v325_v40 = vadd.f32 %v317_v15, %v306_v37 }
 0x12d   : > { %702 = vtanh.f32 %v319_v17 }
 0x12e   : > { %704 = vtanh.f32 %v323_v18 }
 0x12f   : > { %706 = vtanh.f32 %v321_v19 }
 0x130   : > { %708 = vtanh.f32 %v320_v24 }
 0x131   : > { %710 = vtanh.f32 %v326_v25  ;;  %v855_v25 = vmov 1983009808  }
 0x132   : > { %v339_v28 = vpop.permute.xlu0 %338  ;;  %712 = vtanh.f32 %v322_v26  ;;  %v452_v26 = vunpack.c.l.s4 %v855_v25 }
 0x133   : > { %v703_v29 = vpop.eup %702  ;;  %714 = vtanh.f32 %v324_v38 }
 0x134   : > { %v705_v31 = vpop.eup %704  ;;  %v341_v32 = vmul.f32 %v703_v29, %v339_v28  ;;  %716 = vtanh.f32 %v325_v40 }
 0x135   : > { %v707_v33 = vpop.eup %706  ;;  %v345_v34 = vmul.f32 %v705_v31, %v339_v28  ;;  %v856_v31 = vmov 1934713408  }
 0x136   : > { %357 = vrot.lane.b32.xlu1 %v341_v32, %s854_s30  ;;  %v343_v36 = vmul.f32 %v707_v33, %v339_v28  ;;  %v709_v39 = vpop.eup %708  ;;  %v462_v32 = vunpack.c.l.s4 %v856_v31 }
 0x137   : > { %365 = vrot.lane.b32.xlu0 %v345_v34, %s854_s30  ;;  %v711_v41 = vpop.eup %710  ;;  %v342_v43 = vmul.f32 %v709_v39, %v339_v28 }
 0x138   : > { %361 = vrot.lane.b32.xlu2 %v343_v36, %s854_s30  ;;  %v713_v42 = vpop.eup %712  ;;  %v348_v44 = vmul.f32 %v711_v41, %v339_v28  ;;  %v453_v36 = vunpack.c.0.s8 %v452_v26  ;;  %v463_v40 = vunpack.c.0.s8 %v462_v32 }
 0x139   : > { %v344_v45 = vmul.f32 %v713_v42, %v339_v28  ;;  %v715_v46 = vpop.eup %714 }
 0x13a   : > { %v717_v47 = vpop.eup %716  ;;  %v346_v48 = vmul.f32 %v715_v46, %v339_v28 }
 0x13b   : > { %v347_v49 = vmul.f32 %v717_v47, %v339_v28 }
 0x13e   : > { %359 = vrot.lane.b32.xlu1 %v342_v43, %s854_s30 }
 0x13f   : > { %371 = vrot.lane.b32.xlu0 %v348_v44, %s854_s30 }
 0x140   : > { %363 = vrot.lane.b32.xlu2 %v344_v45, %s854_s30 }
 0x146   : > { %367 = vrot.lane.b32.xlu1 %v346_v48, %s854_s30 }
 0x148   : > { %369 = vrot.lane.b32.xlu2 %v347_v49, %s854_s30 }
 0x192   : > { %v362_v50 = vpop.permute.xlu2 %361 }
 0x193   : > { %v387_v51 = vsel %vm268_vm0, %v362_v50, 0.0 }
 0x194   : > { %388 = vadd.xlane.f32.xlu0 %v387_v51 }
 0x19a   : > { %v364_v52 = vpop.permute.xlu2 %363 }
 0x19b   : > { %v390_v63 = vsel %vm268_vm0, %v364_v52, 0.0 }
 0x1a2   : > { %v370_v53 = vpop.permute.xlu2 %369 }
 0x1a3   : > { %v399_v54 = vsel %vm268_vm0, %v370_v53, 0.0 }
 0x1a4   : > { %400 = vadd.xlane.f32.xlu0 %v399_v54 }
 0x1a8   : > { %v358_v55 = vpop.permute.xlu1 %357 }
 0x1a9   : > { %v381_v56 = vsel %vm268_vm0, %v358_v55, 0.0  ;;  %v366_v57 = vpop.permute.xlu0 %365 }
 0x1aa   : > { %382 = vadd.xlane.f32.xlu1 %v381_v56  ;;  %v393_v59 = vsel %vm268_vm0, %v366_v57, 0.0 }
 0x1b0   : > { %v360_v58 = vpop.permute.xlu1 %359 }
 0x1b1   : > { %v384_v60 = vsel %vm268_vm0, %v360_v58, 0.0  ;;  %v372_v61 = vpop.permute.xlu0 %371 }
 0x1b2   : > { %394 = vadd.xlane.f32.xlu1 %v393_v59  ;;  %385 = vadd.xlane.f32.xlu2 %v384_v60  ;;  %v402_v62 = vsel %vm268_vm0, %v372_v61, 0.0 }
 0x1b8   : > { %v368_v0 = vpop.permute.xlu1 %367 }
 0x1b9   : > { %v396_v1 = vsel %vm268_vm0, %v368_v0, 0.0 }
 0x1ba   : > { %403 = vadd.xlane.f32.xlu1 %v402_v62  ;;  %391 = vadd.xlane.f32.xlu2 %v390_v63 }
 0x1c2   : > { %397 = vadd.xlane.f32.xlu2 %v396_v1 }
 0x207   : > { %v389_v7 = vpop.xlane.xlu0 %388 }
 0x208   : > { %v409_v14 = vadd.f32 %v406_v5, %v389_v7 }
 0x20a   : > { %v427_v19 = vperm.slane %v409_v14, %v424_v9 }
 0x217   : > { %v401_v16 = vpop.xlane.xlu0 %400 }
 0x218   : > { %v413_v22 = vadd.f32 %v406_v5, %v401_v16 }
 0x21a   : > { %v431_v34 = vperm.slane %v413_v22, %v424_v9 }
 0x21d   : > { %v383_v2 = vpop.xlane.xlu1 %382 }
 0x21e   : > { %v407_v10 = vadd.f32 %v406_v5, %v383_v2 }
 0x220   : > { %v425_v15 = vperm.slane %v407_v10, %v424_v9 }
 0x225   : > { %v386_v3 = vpop.xlane.xlu2 %385  ;;  %v395_v6 = vpop.xlane.xlu1 %394 }
 0x226   : > { %v408_v8 = vadd.f32 %v406_v5, %v386_v3  ;;  %v411_v20 = vadd.f32 %v406_v5, %v395_v6 }
 0x228   : > { %v426_v12 = vperm.slane %v408_v8, %v424_v9  ;;  %v429_v30 = vperm.slane %v411_v20, %v424_v9 }
 0x22a   : > { %v434_v17 = vsel %vm433_vm1, %v426_v12, %v425_v15 }
 0x22b   : > { %v436_v23 = vsel %vm435_vm2, %v427_v19, %v434_v17 }
 0x22d   : > { %v392_v11 = vpop.xlane.xlu2 %391  ;;  %v404_v21 = vpop.xlane.xlu1 %403 }
 0x22e   : > { %v410_v13 = vadd.f32 %v406_v5, %v392_v11  ;;  %v414_v28 = vadd.f32 %v406_v5, %v404_v21 }
 0x230   : > { %v428_v18 = vperm.slane %v410_v13, %v424_v9  ;;  %v432_v37 = vperm.slane %v414_v28, %v424_v9 }
 0x232   : > { %v438_v27 = vsel %vm437_vm3, %v428_v18, %v436_v23 }
 0x233   : > { %v440_v35 = vsel %vm439_vm4, %v429_v30, %v438_v27 }
 0x235   : > { %v398_v24 = vpop.xlane.xlu2 %397 }
 0x236   : > { %v412_v29 = vadd.f32 %v406_v5, %v398_v24 }
 0x238   : > { %v430_v33 = vperm.slane %v412_v29, %v424_v9 }
 0x23a   : > { %v442_v38 = vsel %vm441_vm5, %v430_v33, %v440_v35 }
 0x23b   : > { %v444_v39 = vsel %vm443_vm6, %v431_v34, %v442_v38 }
 0x23c   : > { %v446_v41 = vsel %vm445_vm7, %v432_v37, %v444_v39 }
 0x23d   : > { %v454_v42 = vperm.slane %v446_v41, %v453_v36  ;;  %v448_v43 = vrot.slane %v446_v41, 4 }
 0x23f   : > { %v464_v44 = vperm.slane %v454_v42, %v463_v40  ;;  %v459_v45 = vrot.slane %v454_v42, 4  ;;  %v450_v46 = vsel %vm449_vm8, 0.0, %v448_v43 }
 0x240   : > { %v458_v47 = vperm.slane %v450_v46, %v453_v36 }
 0x241   : > { %v479_v48 = vrot.slane %v464_v44, 4  ;;  %v460_v49 = vsel %vm449_vm8, 0.0, %v459_v45 }
 0x242   : > { %v468_v50 = vperm.slane %v460_v49, %v463_v40  ;;  %v474_v52 = vperm.slane %v458_v47, %v463_v40  ;;  %v469_v54 = vrot.slane %v458_v47, 4 }
 0x243   : > { %v480_v51 = vsel %vm449_vm8, 0.0, %v479_v48 }
 0x244   : > { %488 = vrot.lane.b32.xlu2 %v480_v51, %s857_s7  ;;  %492 = vrot.lane.b32.xlu0 %v468_v50, %s858_s9  ;;  %v481_v53 = vrot.slane %v468_v50, 4  ;;  %v483_v56 = vrot.slane %v474_v52, 4  ;;  %v470_v57 = vsel %vm449_vm8, 0.0, %v469_v54  ;;  %s798_s7 = scalar_lea.hbm %s1064_s5, 2 }
 0x245   : > { %v478_v59 = vperm.slane %v470_v57, %v463_v40 }
 0x246   : > { %v482_v55 = vsel %vm449_vm8, 0.0, %v481_v53  ;;  %v484_v58 = vsel %vm449_vm8, 0.0, %v483_v56 }
 0x247   : > { %496 = vrot.lane.b32.xlu1 %v482_v55, %s859_s10  ;;  %v485_v60 = vrot.slane %v478_v59, 4 }
 0x249   : > { %v486_v61 = vsel %vm449_vm8, 0.0, %v485_v60 }
 0x24c   : > { %500 = vrot.lane.b32.xlu0 %v474_v52, %s853_s24  ;;  %504 = vrot.lane.b32.xlu2 %v484_v58, %s860_s16  ;;  %s543_s24 = sshll.u32 %s539_s25, 4  ;;  %s544_s24 = int_to_ptr.hbm [resolvable:$true] %s543_s24 }
 0x24d   : > { %s792_s29 = sshra.s32 %s544_s24, 4  ;;  %s793_s29 = int_to_ptr.hbm [resolvable:$true] %s792_s29 }
 0x24e   : > { %s794_s26 = scalar_lea.hbm %s793_s29, 1  ;;  %p799_p12 = scmp.lt.s32.totalorder %s793_s29, %s1064_s5 }
 0x24f   : > { %508 = vrot.lane.b32.xlu1 %v478_v59, %s861_s17  ;;  %p795_p1 = scmp.ne.s32.totalorder %s793_s29, %s794_s26  ;;  %p800_p8 = scmp.lt.s32.totalorder %s798_s7, %s794_s26 }
 0x251   : > { %p796_p3 = pnand %p795_p1, %p956_p13  ;;  %p801_p7 = por %p800_p8, %p799_p12 }
 0x253   : > { %p797_p5 = pneg %p796_p3 }
 0x254   : > { %512 = vrot.lane.b32.xlu0 %v486_v61, %s862_s18 }
 0x255   : > { %p802_p9 = pnand %p801_p7, %p797_p5 }
 0x29e   : > { %v489_v63 = vpop.permute.xlu2 %488 }
 0x29f   : > { %v516_v1 = vsel %vm515_vm9, %v464_v44, %v489_v63 }
 0x2a6   : > { %v505_v6 = vpop.permute.xlu2 %504 }
 0x2b6   : > { %v493_v62 = vpop.permute.xlu0 %492 }
 0x2b7   : > { %v518_v2 = vsel %vm517_vm10, %v516_v1, %v493_v62 }
 0x2b9   : > { %v497_v0 = vpop.permute.xlu1 %496 }
 0x2ba   : > { %v520_v4 = vsel %vm519_vm11, %v518_v2, %v497_v0 }
 0x2be   : > { %v501_v3 = vpop.permute.xlu0 %500 }
 0x2bf   : > { %v521_v5 = vsel %vm268_vm0, %v520_v4, %v501_v3 }
 0x2c0   : > { %v523_v7 = vsel %vm522_vm12, %v521_v5, %v505_v6 }
 0x2c1   : > { %v509_v8 = vpop.permute.xlu1 %508 }
 0x2c2   : > { %v525_v9 = vsel %vm524_vm13, %v523_v7, %v509_v8 }
 0x2c6   : > { %v513_v10 = vpop.permute.xlu0 %512 }
 0x2c7   : > { %v527_v11 = vsel %vm526_vm14, %v525_v9, %v513_v10 }
 0x2c8   : > { %529 = vst.msk [vmem:[%s258_s27] sm:$0x1] %vm528_vm15, %v527_v11 }
 0x2c9   : > { %805 = shalt.err (!%p802_p9)
}
 0x2ca   : > { %637 = dma.vmem_to_hbm [thread:$0]  (%p956_p13), %s542_s12, 16, %s544_s24, %s531_s28  }
 0x2cb PF: > { %s555_s14 = sand.u32 1, %s836_s20   ;;  %p1070_p10 = scmp.ge.s32.totalorder %s848_s23, 2 }
 0x2cc   : > { %s556_s16 = scalar_lea.sflag [#allocation5], %s555_s14 }
 0x2cd   : > { %p648_p11 = pnand %p1070_p10, %p961_p4 }
 0x2cf   : > { %p649_p0 = pneg %p648_p11 }
 0x2d1   : > { %831 = dma.done.wait (%p649_p0), %s556_s16, 16  }
 0x2d2   : > { %833 = vsyncadd (%p649_p0), %s556_s16, 4294967280  ;;  %p20_p2 = scmp.ge.s32.totalorder %s936_s8, 4   ;;  %s1071_s20 = smov %s840_s21 }
 0x2d3   : > { %s1072_s21 = smov %s844_s22  ;;  %s1073_s22 = smov %s948_s11 }
 0x2d4   : > { %s1074_s23 = smov %s936_s8  ;;  %22 = sbr.rel (!%p20_p2) target bundleno = 8 (0x8), region = 89 }
 0x2d9   :  { %561 = vsyncpa [#allocation4], 1 }
 0x2da   :  { %563 = vsyncpa [#allocation4 + $0x1], 1 }
 0x2db   :  { %564 = vsyncpa [#allocation7], 1 }
 0x2dc   :  { %565 = vsyncpa [#allocation5], 1 }
 0x2dd   :  { %567 = vsyncpa [#allocation5 + $0x1], 1 }

</bundles_post_ra>
